<compile_context>
chip_gen: v6e
topology: v6e:2x2x1
jax: 0.10.0
libtpu: 0.0.40
codegen_flags: <defaults>
</compile_context>

<pallas_src>
import functools

import jax
import jax.numpy as jnp
from jax import lax
from jax.experimental import pallas as pl
from jax.experimental.pallas import tpu as pltpu


def _adaptive_embedding_kernel(ids_ref, *refs, cutoff_starts, d_proj):
    """refs = (W_0, W_1, ..., out_ref) with W_i = table_i @ proj_i.T * emb_scale."""
    out_ref = refs[-1]
    w_refs = refs[:-1]

    ids = ids_ref[...]                       # (tile_n, 1) int32
    tn = ids.shape[0]
    acc = jnp.zeros((tn, d_proj), jnp.float32)

    for i, w_ref in enumerate(w_refs):
        w = w_ref[...]                       # (vocab_i, d_proj), scale pre-folded
        vocab_i = w.shape[0]

        # One-hot gather on the MXU.  For ids outside this cluster the local index
        # is negative or >= vocab_i, so the one-hot row is all zeros and the
        # contribution is exactly 0 -- no membership mask needed.
        local = ids - cutoff_starts[i]                                  # (tn, 1)
        col = lax.broadcasted_iota(jnp.int32, (tn, vocab_i), 1)         # (tn, V_i)
        onehot = (col == local).astype(jnp.float32)                     # (tn, V_i)
        acc = acc + jnp.dot(onehot, w, preferred_element_type=jnp.float32)

    out_ref[...] = acc


def adaptive_embedding(inp, tables, projs, cutoff_ends, d_proj, *, tile_n=256):
    """Pallas forward of AdaptiveEmbedding (general div_val path).

    inp:     (B, S) int32 token ids
    tables:  list of (vocab_i, d_emb_i) float32 embedding tables
    projs:   list of (d_proj, d_emb_i) float32 projection matrices
    returns: (B, S, d_proj) float32
    """
    B, S = inp.shape
    N = B * S
    emb_scale = float(d_proj) ** 0.5

    # Pre-fuse each cluster's table, projection and the emb_scale into a single
    # (vocab_i, d_proj) weight.  Done once in the wrapper (plain XLA matmuls).
    fused = [(tbl.astype(jnp.float32) @ prj.astype(jnp.float32).T) * emb_scale
             for tbl, prj in zip(tables, projs)]
    cutoff_starts = tuple(int(c) for c in cutoff_ends[:-1])

    # Cap tile_n so the (tile_n, max_vocab) one-hot intermediates plus the
    # double-buffered blocks stay comfortably inside v7x's 64 MiB VMEM.
    max_vocab = max(w.shape[0] for w in fused)
    param_bytes = sum(w.shape[0] * w.shape[1] * 4 for w in fused)

    def vmem_estimate(tn):
        return (2 * (tn * 4 + tn * d_proj * 4)     # ids + out blocks, double buffered
                + 2 * param_bytes                  # fused weights, double buffered
                + tn * max_vocab * 4               # largest one-hot intermediate
                + tn * d_proj * 4)                 # f32 accumulator

    tile_n = max(8, (tile_n // 8) * 8)
    while tile_n > 8 and vmem_estimate(tile_n) > (28 << 20):
        tile_n //= 2

    # Pad the flat token axis to a multiple of tile_n (pad ids are 0 -> valid id;
    # their rows are discarded below).
    n_pad = pl.cdiv(N, tile_n) * tile_n
    ids = inp.reshape(N).astype(jnp.int32)
    if n_pad != N:
        ids = jnp.pad(ids, (0, n_pad - N))
    ids = ids.reshape(n_pad, 1)

    in_specs = [pl.BlockSpec((tile_n, 1), lambda t: (t, 0))]
    for w in fused:
        # Constant full-array block; index_map does not depend on the grid step.
        in_specs.append(pl.BlockSpec(w.shape, lambda t: (0, 0)))

    kernel = functools.partial(
        _adaptive_embedding_kernel,
        cutoff_starts=cutoff_starts,
        d_proj=d_proj,
    )

    total_vocab = sum(w.shape[0] for w in fused)
    cost = pl.CostEstimate(
        flops=2 * n_pad * total_vocab * d_proj,
        transcendentals=0,
        bytes_accessed=n_pad * 4 + param_bytes + n_pad * d_proj * 4,
    )

    out_flat = pl.pallas_call(
        kernel,
        out_shape=jax.ShapeDtypeStruct((n_pad, d_proj), jnp.float32),
        grid_spec=pltpu.PrefetchScalarGridSpec(
            num_scalar_prefetch=0,
            grid=(n_pad // tile_n,),
            in_specs=in_specs,
            out_specs=pl.BlockSpec((tile_n, d_proj), lambda t: (t, 0)),
        ),
        compiler_params=pltpu.CompilerParams(
            dimension_semantics=("parallel",),
            vmem_limit_bytes=32 * 1024 * 1024,
        ),
        cost_estimate=cost,
    )(ids, *fused)

    return out_flat[:N].reshape(B, S, d_proj)


def adaptive_embedding_ref(inp, tables, projs, cutoff_ends, d_proj):
    """Pure-JAX reference mirroring the PyTorch forward (unfused, two matmuls)."""
    B, S = inp.shape
    inp_flat = inp.reshape(-1)
    emb_flat = jnp.zeros((inp_flat.shape[0], d_proj), jnp.float32)
    for i in range(len(tables)):
        l_idx, r_idx = cutoff_ends[i], cutoff_ends[i + 1]
        mask = (inp_flat >= l_idx) & (inp_flat < r_idx)
        local = jnp.clip(inp_flat - l_idx, 0, tables[i].shape[0] - 1)
        emb_i = jnp.take(tables[i], local, axis=0)          # (N, d_emb_i)
        out_i = emb_i @ projs[i].T                          # (N, d_proj)
        emb_flat = jnp.where(mask[:, None], out_i, emb_flat)
    embed = emb_flat.reshape(B, S, d_proj)
    return embed * (float(d_proj) ** 0.5)


if __name__ == "__main__":
    # Module hyperparameters (small, consistent with the PyTorch __init__).
    n_token = 144
    d_embed = 32
    d_proj = 32
    cutoffs = [48, 96]
    div_val = 2
    cutoff_ends = [0] + cutoffs + [n_token]

    key = jax.random.PRNGKey(0)
    keys = jax.random.split(key, 2 * len(cutoff_ends))

    tables, projs = [], []
    for i in range(len(cutoff_ends) - 1):
        l_idx, r_idx = cutoff_ends[i], cutoff_ends[i + 1]
        d_emb_i = d_embed // (div_val ** i)
        tables.append(
            0.02 * jax.random.normal(keys[2 * i], (r_idx - l_idx, d_emb_i), jnp.float32))
        projs.append(
            0.02 * jax.random.normal(keys[2 * i + 1], (d_proj, d_emb_i), jnp.float32))

    # Deterministic example input: (B, S) token ids.
    B, S = 2, 8
    inp = jax.random.randint(jax.random.PRNGKey(0), (B, S), 0, n_token, jnp.int32)

    out = adaptive_embedding(inp, tables, projs, cutoff_ends, d_proj)
    out = jax.block_until_ready(out)

    ref = adaptive_embedding_ref(inp, tables, projs, cutoff_ends, d_proj)
    assert out.shape == (B, S, d_proj)
    assert jnp.allclose(out, ref, atol=1e-5, rtol=1e-5), "mismatch vs reference"

    print("KERNEL_OK")
</pallas_src>

<mosaic_0001>
module attributes {stable_mosaic.version = 11 : i64} {
  func.func @_adaptive_embedding_kernel(%arg0: i32, %arg1: memref<256x1xi32, #tpu.memory_space<vmem>>, %arg2: memref<48x32xf32, #tpu.memory_space<vmem>>, %arg3: memref<48x32xf32, #tpu.memory_space<vmem>>, %arg4: memref<48x32xf32, #tpu.memory_space<vmem>>, %arg5: memref<256x32xf32, #tpu.memory_space<vmem>>) attributes {dimension_semantics = [#tpu.dimension_semantics<parallel>], iteration_bounds = array<i64: 1>, scalar_prefetch = 0 : i64, scratch_operands = 0 : i64, tpu.core_type = #tpu.core_type<tc>, window_params = [{transform_indices = @transform_0, window_bounds = array<i64: 256, 1>}, {pipeline_mode = #tpu.pipeline_mode<synchronous>, transform_indices = @transform_1, window_bounds = array<i64: 48, 32>}, {pipeline_mode = #tpu.pipeline_mode<synchronous>, transform_indices = @transform_2, window_bounds = array<i64: 48, 32>}, {pipeline_mode = #tpu.pipeline_mode<synchronous>, transform_indices = @transform_3, window_bounds = array<i64: 48, 32>}, {transform_indices = @transform_4, window_bounds = array<i64: 256, 32>}]} {
    %c0 = arith.constant 0 : index
    %c0_0 = arith.constant 0 : index
    %0 = vector.load %arg1[%c0, %c0_0] : memref<256x1xi32, #tpu.memory_space<vmem>>, vector<256x1xi32>
    %cst = arith.constant 0.000000e+00 : f32
    %1 = vector.broadcast %cst : f32 to vector<256x32xf32>
    %c0_1 = arith.constant 0 : index
    %c0_2 = arith.constant 0 : index
    %2 = vector.load %arg2[%c0_1, %c0_2] : memref<48x32xf32, #tpu.memory_space<vmem>>, vector<48x32xf32>
    %c0_i32 = arith.constant 0 : i32
    %3 = vector.broadcast %c0_i32 : i32 to vector<256x1xi32>
    %4 = arith.subi %0, %3 : vector<256x1xi32>
    %5 = tpu.iota {dimensions = array<i32: 1>} : vector<256x48xi32>
    %6 = vector.broadcast %4 : vector<256x1xi32> to vector<256x48xi32>
    %7 = arith.cmpi eq, %5, %6 : vector<256x48xi32>
    %8 = arith.extui %7 : vector<256x48xi1> to vector<256x48xi32>
    %9 = arith.sitofp %8 : vector<256x48xi32> to vector<256x48xf32>
    %cst_3 = arith.constant dense<0.000000e+00> : vector<256x32xf32>
    %10 = tpu.matmul %9, %2, %cst_3 {dimension_numbers = #tpu.dot_dimension_numbers<[1], [0], [0], [1], [0, 0, 1, 1], [], []>} : vector<256x48xf32>, vector<48x32xf32>, vector<256x32xf32> -> vector<256x32xf32>
    %11 = arith.addf %1, %10 : vector<256x32xf32>
    %c0_4 = arith.constant 0 : index
    %c0_5 = arith.constant 0 : index
    %12 = vector.load %arg3[%c0_4, %c0_5] : memref<48x32xf32, #tpu.memory_space<vmem>>, vector<48x32xf32>
    %c48_i32 = arith.constant 48 : i32
    %13 = vector.broadcast %c48_i32 : i32 to vector<256x1xi32>
    %14 = arith.subi %0, %13 : vector<256x1xi32>
    %15 = tpu.iota {dimensions = array<i32: 1>} : vector<256x48xi32>
    %16 = vector.broadcast %14 : vector<256x1xi32> to vector<256x48xi32>
    %17 = arith.cmpi eq, %15, %16 : vector<256x48xi32>
    %18 = arith.extui %17 : vector<256x48xi1> to vector<256x48xi32>
    %19 = arith.sitofp %18 : vector<256x48xi32> to vector<256x48xf32>
    %cst_6 = arith.constant dense<0.000000e+00> : vector<256x32xf32>
    %20 = tpu.matmul %19, %12, %cst_6 {dimension_numbers = #tpu.dot_dimension_numbers<[1], [0], [0], [1], [0, 0, 1, 1], [], []>} : vector<256x48xf32>, vector<48x32xf32>, vector<256x32xf32> -> vector<256x32xf32>
    %21 = arith.addf %11, %20 : vector<256x32xf32>
    %c0_7 = arith.constant 0 : index
    %c0_8 = arith.constant 0 : index
    %22 = vector.load %arg4[%c0_7, %c0_8] : memref<48x32xf32, #tpu.memory_space<vmem>>, vector<48x32xf32>
    %c96_i32 = arith.constant 96 : i32
    %23 = vector.broadcast %c96_i32 : i32 to vector<256x1xi32>
    %24 = arith.subi %0, %23 : vector<256x1xi32>
    %25 = tpu.iota {dimensions = array<i32: 1>} : vector<256x48xi32>
    %26 = vector.broadcast %24 : vector<256x1xi32> to vector<256x48xi32>
    %27 = arith.cmpi eq, %25, %26 : vector<256x48xi32>
    %28 = arith.extui %27 : vector<256x48xi1> to vector<256x48xi32>
    %29 = arith.sitofp %28 : vector<256x48xi32> to vector<256x48xf32>
    %cst_9 = arith.constant dense<0.000000e+00> : vector<256x32xf32>
    %30 = tpu.matmul %29, %22, %cst_9 {dimension_numbers = #tpu.dot_dimension_numbers<[1], [0], [0], [1], [0, 0, 1, 1], [], []>} : vector<256x48xf32>, vector<48x32xf32>, vector<256x32xf32> -> vector<256x32xf32>
    %31 = arith.addf %21, %30 : vector<256x32xf32>
    %c0_10 = arith.constant 0 : index
    %c0_11 = arith.constant 0 : index
    %32 = vector.load %arg5[%c0_10, %c0_11] : memref<256x32xf32, #tpu.memory_space<vmem>>, vector<256x32xf32>
    tpu.vector_store %arg5[%c0_10, %c0_11], %31 {strides = array<i32>} : memref<256x32xf32, #tpu.memory_space<vmem>>, vector<256x32xf32>,
    return
  }
  func.func @transform_0(%arg0: i32) -> (i32, i32) {
    %c0_i32 = arith.constant 0 : i32
    %c0_i32_0 = arith.constant 0 : i32
    return %arg0, %c0_i32 : i32, i32
  }
  func.func @transform_1(%arg0: i32) -> (i32, i32) {
    %c0_i32 = arith.constant 0 : i32
    %c0_i32_0 = arith.constant 0 : i32
    %c0_i32_1 = arith.constant 0 : i32
    return %c0_i32, %c0_i32_0 : i32, i32
  }
  func.func @transform_2(%arg0: i32) -> (i32, i32) {
    %c0_i32 = arith.constant 0 : i32
    %c0_i32_0 = arith.constant 0 : i32
    %c0_i32_1 = arith.constant 0 : i32
    return %c0_i32, %c0_i32_0 : i32, i32
  }
  func.func @transform_3(%arg0: i32) -> (i32, i32) {
    %c0_i32 = arith.constant 0 : i32
    %c0_i32_0 = arith.constant 0 : i32
    %c0_i32_1 = arith.constant 0 : i32
    return %c0_i32, %c0_i32_0 : i32, i32
  }
  func.func @transform_4(%arg0: i32) -> (i32, i32) {
    %c0_i32 = arith.constant 0 : i32
    %c0_i32_0 = arith.constant 0 : i32
    return %arg0, %c0_i32 : i32, i32
  }
}

</mosaic_0001>

<bundles_post_ra>
// kernel: tpu_custom_call.1
= control target key start
LH: loop header
LB: loop body
LE: loop exit
PB: predicated region body
PF: predicated region fallthrough
CT: control target
= control target key end

     0   :  { %v2308_v0 = vmov 0   ;;  %vm479_vm0 = vcmask 392192   ;;  %s3133_s0 = inlined_call_operand.vmem [shape: s32[256,1], index: 0, kind: input, shape index: {}]   ;;  %s3134_s2 = inlined_call_operand.vmem [shape: f32[48,32], index: 2, kind: input, shape index: {}]   ;;  %s3135_s1 = inlined_call_operand.vmem [shape: f32[48,32], index: 1, kind: input, shape index: {}]   ;;  %s3136_s3 = inlined_call_operand.vmem [shape: f32[48,32], index: 3, kind: input, shape index: {}]   ;;  %s3137_s4 = inlined_call_operand.vmem [shape: f32[256,32], index: 4, kind: output, shape index: {}]  }
   0x1   :  { %2307 = vset.pattern.permute.xlu1 %v2308_v0  ;;  %2306 = vset.pattern.permute.xlu0 %v2308_v0  ;;  %v2338_v1 = vld [vmem:[%s3133_s0 + $0x10] sm:$0xff]  ;;  %v2343_v2 = vld [vmem:[%s3133_s0] sm:$0xff]  ;;  %v2350_v3 = vld [vmem:[%s3133_s0 + $0x18] sm:$0xff] }
   0x2   :  { %64 = vperm.xlu1 %2307, %v2338_v1   ;;  %58 = vperm.xlu0 %2306, %v2343_v2   ;;  %v2355_v4 = vld [vmem:[%s3133_s0 + $0x8] sm:$0xff]  ;;  %v2367_v6 = vld [vmem:[%s3133_s0 + $0x20] sm:$0xff]  ;;  %v2380_v9 = vld [vmem:[%s3133_s0 + $0x30] sm:$0xff]  ;;  %v1774_v14 = vadd.s32 4294967248, %v2343_v2  ;;  %v1776_v23 = vadd.s32 4294967248, %v2338_v1  ;;  %v1777_v26 = vadd.s32 4294967248, %v2350_v3 }
   0x3   :  { %v2362_v5 = vld [vmem:[%s3133_s0 + $0x28] sm:$0xff]  ;;  %v2372_v7 = vld [vmem:[%s3133_s0 + $0x80] sm:$0xff]  ;;  %v2399_v15 = vld [vmem:[%s3133_s0 + $0x90] sm:$0xff]  ;;  %v1775_v17 = vadd.s32 4294967248, %v2355_v4  ;;  %v1778_v30 = vadd.s32 4294967248, %v2367_v6  ;;  %v1780_v36 = vadd.s32 4294967248, %v2380_v9 }
   0x4   :  { %v1790_v8 = vadd.s32 4294967248, %v2372_v7  ;;  %v2385_v10 = vld [vmem:[%s3133_s0 + $0x88] sm:$0xff]  ;;  %v253_v12 = vld [vmem:[%s3134_s2 + $0x20] sm:$0xff]  ;;  %v252_v16 = vld [vmem:[%s3134_s2 + $0x18] sm:$0xff]  ;;  %v1792_v18 = vadd.s32 4294967248, %v2399_v15  ;;  %v1779_v32 = vadd.s32 4294967248, %v2362_v5 }
   0x5   :  { %v254_v11 = vld [vmem:[%s3134_s2 + $0x28] sm:$0xff]  ;;  %v1791_v13 = vadd.s32 4294967248, %v2385_v10  ;;  %v251_v19 = vld [vmem:[%s3134_s2 + $0x10] sm:$0xff]  ;;  %v2412_v20 = vld [vmem:[%s3133_s0 + $0x98] sm:$0xff] }
   0x6   :  { %67 = vperm.xlu1 %2307, %v2350_v3   ;;  %61 = vperm.xlu0 %2306, %v2355_v4   ;;  %v250_v21 = vld [vmem:[%s3134_s2 + $0x8] sm:$0xff]  ;;  %v1793_v22 = vadd.s32 4294967248, %v2412_v20  ;;  %v2422_v24 = vld [vmem:[%s3133_s0 + $0xa0] sm:$0xff]  ;;  %v2439_v31 = vld [vmem:[%s3133_s0 + $0xb0] sm:$0xff] }
   0x7   :  { %2292 = vmatprep.subr.mxu1 %v254_v11  ;;  %2112 = vmatprep.subr.mxu0 %v254_v11  ;;  %v249_v25 = vld [vmem:[%s3134_s2] sm:$0xff]  ;;  %v1794_v27 = vadd.s32 4294967248, %v2422_v24  ;;  %v2432_v28 = vld [vmem:[%s3133_s0 + $0xa8] sm:$0xff]  ;;  %v1796_v33 = vadd.s32 4294967248, %v2439_v31  ;;  %v2446_v34 = vld [vmem:[%s3133_s0 + $0xb8] sm:$0xff] }
   0x8   :  { %2298 = vmatpush3.msra.mxu1 %v254_v11  ;;  %2113 = vmatpush3.msra.mxu0 %v254_v11  ;;  %v1795_v29 = vadd.s32 4294967248, %v2432_v28  ;;  %v1797_v35 = vadd.s32 4294967248, %v2446_v34  ;;  %v2453_v37 = vld [vmem:[%s3133_s0 + $0x38] sm:$0xff]  ;;  %v2458_v38 = vld [vmem:[%s3133_s0 + $0xc0] sm:$0xff]  ;;  %v2465_v41 = vld [vmem:[%s3133_s0 + $0xc8] sm:$0xff] }
   0x9   :  { %2293 = vmatprep.subr.mxu1 %v253_v12  ;;  %2114 = vmatprep.subr.mxu0 %v253_v12  ;;  %v1781_v39 = vadd.s32 4294967248, %v2453_v37  ;;  %v1798_v40 = vadd.s32 4294967248, %v2458_v38  ;;  %v2470_v42 = vld [vmem:[%s3133_s0 + $0x40] sm:$0xff]  ;;  %v1799_v43 = vadd.s32 4294967248, %v2465_v41  ;;  %v2477_v45 = vld [vmem:[%s3133_s0 + $0x48] sm:$0xff]  ;;  %v2482_v46 = vld [vmem:[%s3133_s0 + $0xd0] sm:$0xff] }
   0xa   :  { %73 = vperm.xlu1 %2307, %v2362_v5   ;;  %70 = vperm.xlu0 %2306, %v2367_v6   ;;  %v1782_v44 = vadd.s32 4294967248, %v2470_v42  ;;  %v1783_v47 = vadd.s32 4294967248, %v2477_v45  ;;  %v1800_v48 = vadd.s32 4294967248, %v2482_v46  ;;  %v2489_v49 = vld [vmem:[%s3133_s0 + $0xd8] sm:$0xff]  ;;  %v2494_v50 = vld [vmem:[%s3133_s0 + $0x50] sm:$0xff]  ;;  %v2504_v54 = vld [vmem:[%s3133_s0 + $0xe0] sm:$0xff] }
   0xb   :  { %2299 = vmatpush3.msra.mxu1 %v253_v12  ;;  %2115 = vmatpush3.msra.mxu0 %v253_v12  ;;  %v1801_v51 = vadd.s32 4294967248, %v2489_v49  ;;  %v1784_v52 = vadd.s32 4294967248, %v2494_v50  ;;  %v28_v53 = vld [vmem:[%s3133_s0 + $0x58] sm:$0xff]  ;;  %v1802_v56 = vadd.s32 4294967248, %v2504_v54  ;;  %v2510_v57 = vld [vmem:[%s3133_s0 + $0xe8] sm:$0xff]  ;;  %v29_v58 = vld [vmem:[%s3133_s0 + $0x60] sm:$0xff] }
   0xc   :  { %2294 = vmatprep.subr.mxu1 %v252_v16  ;;  %2116 = vmatprep.subr.mxu0 %v252_v16  ;;  %v1785_v55 = vadd.s32 4294967248, %v28_v53  ;;  %v1803_v59 = vadd.s32 4294967248, %v2510_v57  ;;  %v1786_v60 = vadd.s32 4294967248, %v29_v58  ;;  %v30_v61 = vld [vmem:[%s3133_s0 + $0x68] sm:$0xff]  ;;  %v2522_v62 = vld [vmem:[%s3133_s0 + $0xf0] sm:$0xff]  ;;  %v2534_v11 = vld [vmem:[%s3133_s0 + $0xf8] sm:$0xff] }
   0xd   :  { %2300 = vmatpush3.msra.mxu1 %v252_v16  ;;  %2117 = vmatpush3.msra.mxu0 %v252_v16  ;;  %v2527_v63 = vld [vmem:[%s3135_s1 + $0x28] sm:$0xff]  ;;  %v1787_v0 = vadd.s32 4294967248, %v30_v61  ;;  %v31_v12 = vld [vmem:[%s3133_s0 + $0x70] sm:$0xff] }
   0xe   :  { %336 = vperm.xlu1 %2307, %v1790_v8   ;;  %76 = vperm.xlu0 %2306, %v2380_v9   ;;  %v1804_v8 = vadd.s32 4294967248, %v2522_v62  ;;  %v1788_v16 = vadd.s32 4294967248, %v31_v12 }
   0xf   :  { %2295 = vmatprep.subr.mxu1 %v251_v19  ;;  %2118 = vmatprep.subr.mxu0 %v251_v19 }
  0x10   :  { %2301 = vmatpush3.msra.mxu1 %v251_v19  ;;  %2119 = vmatpush3.msra.mxu0 %v251_v19  ;;  %v1902_v19 = vadd.s32 4294967200, %v2343_v2  ;;  %v1908_v2 = vadd.s32 4294967200, %v2380_v9  ;;  %v1915_v9 = vadd.s32 4294967200, %v30_v61 }
  0x11   :  { %2296 = vmatprep.subr.mxu1 %v250_v21  ;;  %2120 = vmatprep.subr.mxu0 %v250_v21 }
  0x12   :  { %339 = vperm.xlu0 %2306, %v1791_v13   ;;  %288 = vperm.xlu1 %2307, %v1774_v14   ;;  %v2542_v13 = vld [vmem:[%s3136_s3 + $0x28] sm:$0xff]  ;;  %v1805_v14 = vadd.s32 4294967248, %v2534_v11 }
  0x13   :  { %2302 = vmatpush3.msra.mxu1 %v250_v21  ;;  %2121 = vmatpush3.msra.mxu0 %v250_v21  ;;  %v1903_v21 = vadd.s32 4294967200, %v2355_v4  ;;  %v1912_v4 = vadd.s32 4294967200, %v2494_v50 }
  0x14   :  { %2297 = vmatprep.subr.mxu1 %v249_v25  ;;  %2122 = vmatprep.subr.mxu0 %v249_v25 }
  0x15   :  { %2303 = vmatpush3.msra.mxu1 %v249_v25  ;;  %2123 = vmatpush3.msra.mxu0 %v249_v25  ;;  %v1906_v25 = vadd.s32 4294967200, %v2367_v6  ;;  %v1914_v6 = vadd.s32 4294967200, %v29_v58 }
  0x16   :  { %291 = vperm.xlu0 %2306, %v1775_v17   ;;  %342 = vperm.xlu1 %2307, %v1792_v18   ;;  %v32_v17 = vld [vmem:[%s3133_s0 + $0x78] sm:$0xff] }
  0x17   :  { %2172 = vmatprep.subr.mxu1 %v2527_v63  ;;  %2232 = vmatprep.subr.mxu0 %v2542_v13  ;;  %v1789_v18 = vadd.s32 4294967248, %v32_v17 }
  0x1a   :  { %345 = vperm.xlu0 %2306, %v1793_v22   ;;  %294 = vperm.xlu1 %2307, %v1776_v23   ;;  %v1904_v22 = vadd.s32 4294967200, %v2338_v1  ;;  %v1905_v23 = vadd.s32 4294967200, %v2350_v3  ;;  %v1910_v1 = vadd.s32 4294967200, %v2470_v42  ;;  %v1911_v3 = vadd.s32 4294967200, %v2477_v45 }
  0x1e   :  { %297 = vperm.xlu0 %2306, %v1777_v26   ;;  %348 = vperm.xlu1 %2307, %v1794_v27   ;;  %v1907_v26 = vadd.s32 4294967200, %v2362_v5  ;;  %v1909_v27 = vadd.s32 4294967200, %v2453_v37  ;;  %v1913_v5 = vadd.s32 4294967200, %v28_v53 }
  0x22   :  { %351 = vperm.xlu0 %2306, %v1795_v29   ;;  %300 = vperm.xlu1 %2307, %v1778_v30   ;;  %v1916_v29 = vadd.s32 4294967200, %v31_v12  ;;  %v1917_v30 = vadd.s32 4294967200, %v32_v17 }
  0x26   :  { %303 = vperm.xlu0 %2306, %v1779_v32   ;;  %354 = vperm.xlu1 %2307, %v1796_v33  }
  0x2a   :  { %357 = vperm.xlu0 %2306, %v1797_v35   ;;  %306 = vperm.xlu1 %2307, %v1780_v36  }
  0x2e   :  { %309 = vperm.xlu0 %2306, %v1781_v39   ;;  %360 = vperm.xlu1 %2307, %v1798_v40   ;;  %v1919_v39 = vadd.s32 4294967200, %v2385_v10  ;;  %v55_v40 = vlaneseq }
  0x32   :  { %363 = vperm.xlu0 %2306, %v1799_v43   ;;  %312 = vperm.xlu1 %2307, %v1782_v44   ;;  %v2580_v44 = vand.u32 127, %v55_v40 }
  0x36   :  { %315 = vperm.xlu0 %2306, %v1783_v47   ;;  %366 = vperm.xlu1 %2307, %v1800_v48   ;;  %v2309_v48 = vmov 0.0  }
  0x3a   :  { %369 = vperm.xlu0 %2306, %v1801_v51   ;;  %318 = vperm.xlu1 %2307, %v1784_v52  }
  0x3e   :  { %321 = vperm.xlu0 %2306, %v1785_v55   ;;  %372 = vperm.xlu1 %2307, %v1802_v56  }
  0x42   :  { %375 = vperm.xlu0 %2306, %v1803_v59   ;;  %324 = vperm.xlu1 %2307, %v1786_v60   ;;  %v1923_v59 = vadd.s32 4294967200, %v2432_v28 }
  0x46   :  { %327 = vperm.xlu0 %2306, %v1787_v0   ;;  %378 = vperm.xlu1 %2307, %v1804_v8   ;;  %v1126_v0 = vld [vmem:[%s3136_s3 + $0x20] sm:$0xff] }
  0x4a   :  { %381 = vperm.xlu0 %2306, %v1805_v14   ;;  %330 = vperm.xlu1 %2307, %v1788_v16   ;;  %v1125_v14 = vld [vmem:[%s3136_s3 + $0x18] sm:$0xff] }
  0x4e   :  { %333 = vperm.xlu0 %2306, %v1789_v18   ;;  %1161 = vperm.xlu1 %2307, %v1902_v19   ;;  %v1924_v18 = vadd.s32 4294967200, %v2439_v31  ;;  %v1925_v19 = vadd.s32 4294967200, %v2446_v34 }
  0x52   :  { %1164 = vperm.xlu0 %2306, %v1903_v21   ;;  %1167 = vperm.xlu1 %2307, %v1904_v22  }
  0x56   :  { %1170 = vperm.xlu0 %2306, %v1905_v23   ;;  %1173 = vperm.xlu1 %2307, %v1906_v25   ;;  %v50_v23 = vld [vmem:[%s3135_s1 + $0x8] sm:$0xff] }
  0x5a   :  { %1176 = vperm.xlu0 %2306, %v1907_v26   ;;  %79 = vperm.xlu1 %2307, %v2453_v37   ;;  %v1918_v37 = vadd.s32 4294967200, %v2372_v7 }
  0x5e   :  { %1179 = vperm.xlu0 %2306, %v1908_v2   ;;  %1182 = vperm.xlu1 %2307, %v1909_v27   ;;  %v49_v27 = vld [vmem:[%s3135_s1] sm:$0xff] }
  0x62   :  { %82 = vperm.xlu0 %2306, %v2470_v42   ;;  %85 = vperm.xlu1 %2307, %v2477_v45  }
  0x66   :  { %1185 = vperm.xlu0 %2306, %v1910_v1   ;;  %1188 = vperm.xlu1 %2307, %v1911_v3   ;;  %v1123_v1 = vld [vmem:[%s3136_s3 + $0x8] sm:$0xff] }
  0x6a   :  { %88 = vperm.xlu0 %2306, %v2494_v50   ;;  %91 = vperm.xlu1 %2307, %v28_v53  }
  0x6e   :  { %1191 = vperm.xlu0 %2306, %v1912_v4   ;;  %1194 = vperm.xlu1 %2307, %v1913_v5   ;;  %v1926_v5 = vadd.s32 4294967200, %v2458_v38 }
  0x72   :  { %94 = vperm.xlu0 %2306, %v29_v58   ;;  %97 = vperm.xlu1 %2307, %v30_v61   ;;  %v1922_v58 = vadd.s32 4294967200, %v2422_v24 }
  0x76   :  { %1197 = vperm.xlu0 %2306, %v1914_v6   ;;  %1200 = vperm.xlu1 %2307, %v1915_v9   ;;  %v1927_v6 = vadd.s32 4294967200, %v2465_v41 }
  0x7a   :  { %100 = vperm.xlu0 %2306, %v31_v12   ;;  %103 = vperm.xlu1 %2307, %v32_v17  }
  0x7d   :  { %v2564_v32 = vpop.permute.xlu1 %64  ;;  %v2566_v33 = vpop.permute.xlu0 %58 }
  0x7e   :  { %1203 = vperm.xlu0 %2306, %v1916_v29   ;;  %1206 = vperm.xlu1 %2307, %v1917_v30   ;;  %v1122_v30 = vld [vmem:[%s3136_s3] sm:$0xff] }
  0x81   :  { %v2568_v35 = vpop.permute.xlu1 %67  ;;  %v2570_v36 = vpop.permute.xlu0 %61 }
  0x82   :  { %106 = vperm.xlu0 %2306, %v2372_v7   ;;  %109 = vperm.xlu1 %2307, %v2385_v10   ;;  %v1920_v7 = vadd.s32 4294967200, %v2399_v15  ;;  %v1921_v10 = vadd.s32 4294967200, %v2412_v20 }
  0x85   :  { %v2576_v42 = vpop.permute.xlu1 %73  ;;  %v2578_v43 = vpop.permute.xlu0 %70 }
  0x86   :  { %1209 = vperm.xlu0 %2306, %v1918_v37   ;;  %1212 = vperm.xlu1 %2307, %v1919_v39  }
  0x89   :  { %v337_v45 = vpop.permute.xlu1 %336  ;;  %v2582_v47 = vpop.permute.xlu0 %76 }
  0x8a   :  { %vm399_vm1 = vcmp.eq.s32.totalorder %v2580_v44, %v337_v45  ;;  %112 = vperm.xlu0 %2306, %v2399_v15   ;;  %115 = vperm.xlu1 %2307, %v2412_v20   ;;  %v53_v15 = vld [vmem:[%s3135_s1 + $0x20] sm:$0xff] }
  0x8b   :  { %v1822_v50 = vsel %vm399_vm1, 1.0, %v2309_v48 }
  0x8c   :  { %2148 = vmatprep.mubr.msk.f32.mxu1 %vm479_vm0, %v1822_v50 }
  0x8d   :  { %v340_v51 = vpop.permute.xlu0 %339  ;;  %v289_v52 = vpop.permute.xlu1 %288 }
  0x8e   :  { %vm400_vm2 = vcmp.eq.s32.totalorder %v2580_v44, %v340_v51  ;;  %vm383_vm3 = vcmp.eq.s32.totalorder %v2580_v44, %v289_v52  ;;  %1215 = vperm.xlu0 %2306, %v1920_v7   ;;  %1218 = vperm.xlu1 %2307, %v1921_v10   ;;  %v1928_v7 = vadd.s32 4294967200, %v2482_v46  ;;  %v1929_v10 = vadd.s32 4294967200, %v2489_v49 }
  0x8f   :  { %v1823_v53 = vsel %vm400_vm2, 1.0, %v2309_v48  ;;  %v1806_v55 = vsel %vm383_vm3, 1.0, %v2309_v48 }
  0x90   :  { %2124 = vmatprep.mubr.msk.f32.mxu0 %vm479_vm0, %v1806_v55  ;;  %2149 = vmatmul.mubr.msk.f32.vlgmr.msra.gmra.mxu1 %vm479_vm0, %v1823_v53 }
  0x91   :  { %v292_v20 = vpop.permute.xlu0 %291  ;;  %v343_v56 = vpop.permute.xlu1 %342  ;;  %2173 = vmatpush3.msra.mxu1 %v2527_v63  ;;  %v52_v63 = vld [vmem:[%s3135_s1 + $0x18] sm:$0xff] }
  0x92   :  { %vm384_vm4 = vcmp.eq.s32.totalorder %v2580_v44, %v292_v20  ;;  %vm401_vm5 = vcmp.eq.s32.totalorder %v2580_v44, %v343_v56  ;;  %118 = vperm.xlu0 %2306, %v2422_v24   ;;  %121 = vperm.xlu1 %2307, %v2432_v28   ;;  %v1930_v20 = vadd.s32 4294967200, %v2504_v54  ;;  %v1931_v56 = vadd.s32 4294967200, %v2510_v57 }
  0x93   :  { %v1807_v60 = vsel %vm384_vm4, 1.0, %v2309_v48  ;;  %v1824_v61 = vsel %vm401_vm5, 1.0, %v2309_v48  ;;  %2174 = vmatprep.subr.mxu1 %v53_v15 }
  0x94   :  { %2125 = vmatmul.mubr.msk.f32.vlgmr.msra.gmra.mxu0 %vm479_vm0, %v1807_v60  ;;  %2151 = vmatprep.mubr.msk.f32.mxu1 %vm479_vm0, %v1824_v61 }
  0x95   :  { %v346_v24 = vpop.permute.xlu0 %345  ;;  %v295_v8 = vpop.permute.xlu1 %294  ;;  %2175 = vmatpush3.msra.mxu1 %v53_v15  ;;  %2233 = vmatpush3.msra.mxu0 %v2542_v13  ;;  %v51_v13 = vld [vmem:[%s3135_s1 + $0x10] sm:$0xff] }
  0x96   :  { %vm402_vm6 = vcmp.eq.s32.totalorder %v2580_v44, %v346_v24  ;;  %vm385_vm7 = vcmp.eq.s32.totalorder %v2580_v44, %v295_v8  ;;  %1221 = vperm.xlu0 %2306, %v1922_v58   ;;  %1224 = vperm.xlu1 %2307, %v1923_v59   ;;  %v1932_v24 = vadd.s32 4294967200, %v2522_v62  ;;  %v1933_v8 = vadd.s32 4294967200, %v2534_v11 }
  0x97   :  { %v1825_v28 = vsel %vm402_vm6, 1.0, %v2309_v48  ;;  %v1808_v12 = vsel %vm385_vm7, 1.0, %v2309_v48  ;;  %2176 = vmatprep.subr.mxu1 %v52_v63  ;;  %2234 = vmatprep.subr.mxu0 %v1126_v0 }
  0x98   :  { %2127 = vmatprep.mubr.msk.f32.mxu0 %vm479_vm0, %v1808_v12  ;;  %2152 = vmatmul.mubr.msk.f32.gmra.mxu1 %vm479_vm0, %v1825_v28 }
  0x99   :  { %v298_v16 = vpop.permute.xlu0 %297  ;;  %v349_v17 = vpop.permute.xlu1 %348  ;;  %2177 = vmatpush3.msra.mxu1 %v52_v63  ;;  %2235 = vmatpush3.msra.mxu0 %v1126_v0 }
  0x9a   :  { %vm386_vm8 = vcmp.eq.s32.totalorder %v2580_v44, %v298_v16  ;;  %vm403_vm9 = vcmp.eq.s32.totalorder %v2580_v44, %v349_v17  ;;  %124 = vperm.xlu0 %2306, %v2439_v31   ;;  %127 = vperm.xlu1 %2307, %v2446_v34   ;;  %v1124_v31 = vld [vmem:[%s3136_s3 + $0x10] sm:$0xff] }
  0x9b   :  { %v1809_v21 = vsel %vm386_vm8, 1.0, %v2309_v48  ;;  %v1826_v22 = vsel %vm403_vm9, 1.0, %v2309_v48  ;;  %2178 = vmatprep.subr.mxu1 %v51_v13  ;;  %2236 = vmatprep.subr.mxu0 %v1125_v14 }
  0x9c   :  { %2128 = vmatmul.mubr.msk.f32.gmra.mxu0 %vm479_vm0, %v1809_v21  ;;  %2154 = vmatprep.mubr.msk.f32.mxu1 %vm479_vm0, %v1826_v22 }
  0x9d   :  { %v352_v25 = vpop.permute.xlu0 %351  ;;  %v301_v34 = vpop.permute.xlu1 %300  ;;  %2179 = vmatpush3.msra.mxu1 %v51_v13  ;;  %2237 = vmatpush3.msra.mxu0 %v1125_v14 }
  0x9e   :  { %vm404_vm10 = vcmp.eq.s32.totalorder %v2580_v44, %v352_v25  ;;  %vm387_vm11 = vcmp.eq.s32.totalorder %v2580_v44, %v301_v34  ;;  %1227 = vperm.xlu0 %2306, %v1924_v18   ;;  %1230 = vperm.xlu1 %2307, %v1925_v19  }
  0x9f   :  { %v1827_v26 = vsel %vm404_vm10, 1.0, %v2309_v48  ;;  %v1810_v2 = vsel %vm387_vm11, 1.0, %v2309_v48  ;;  %2180 = vmatprep.subr.mxu1 %v50_v23  ;;  %2238 = vmatprep.subr.mxu0 %v1124_v31 }
  0xa0   :  { %2130 = vmatprep.mubr.msk.f32.mxu0 %vm479_vm0, %v1810_v2  ;;  %2155 = vmatmul.mubr.msk.f32.gmra.mxu1 %vm479_vm0, %v1827_v26 }
  0xa1   :  { %v304_v3 = vpop.permute.xlu0 %303  ;;  %v355_v4 = vpop.permute.xlu1 %354  ;;  %2181 = vmatpush3.msra.mxu1 %v50_v23  ;;  %2239 = vmatpush3.msra.mxu0 %v1124_v31 }
  0xa2   :  { %vm388_vm12 = vcmp.eq.s32.totalorder %v2580_v44, %v304_v3  ;;  %vm405_vm13 = vcmp.eq.s32.totalorder %v2580_v44, %v355_v4  ;;  %130 = vperm.xlu0 %2306, %v2458_v38   ;;  %133 = vperm.xlu1 %2307, %v2465_v41  }
  0xa3   :  { %v1811_v9 = vsel %vm388_vm12, 1.0, %v2309_v48  ;;  %v1828_v29 = vsel %vm405_vm13, 1.0, %v2309_v48  ;;  %2182 = vmatprep.subr.mxu1 %v49_v27  ;;  %2240 = vmatprep.subr.mxu0 %v1123_v1 }
  0xa4   :  { %2131 = vmatmul.mubr.msk.f32.gmra.mxu0 %vm479_vm0, %v1811_v9  ;;  %2157 = vmatprep.mubr.msk.f32.mxu1 %vm479_vm0, %v1828_v29 }
  0xa5   :  { %v358_v37 = vpop.permute.xlu0 %357  ;;  %v307_v39 = vpop.permute.xlu1 %306  ;;  %2183 = vmatpush3.msra.mxu1 %v49_v27  ;;  %2241 = vmatpush3.msra.mxu0 %v1123_v1 }
  0xa6   :  { %vm406_vm14 = vcmp.eq.s32.totalorder %v2580_v44, %v358_v37  ;;  %vm389_vm15 = vcmp.eq.s32.totalorder %v2580_v44, %v307_v39  ;;  %1233 = vperm.xlu0 %2306, %v1926_v5   ;;  %1236 = vperm.xlu1 %2307, %v1927_v6  }
  0xa7   :  { %v1829_v38 = vsel %vm406_vm14, 1.0, %v2309_v48  ;;  %v1812_v41 = vsel %vm389_vm15, 1.0, %v2309_v48  ;;  %2242 = vmatprep.subr.mxu0 %v1122_v30  ;;  %vm153_vm15 = vcmp.eq.s32.totalorder %v2580_v44, %v2566_v33 }
  0xa8   :  { %2133 = vmatprep.mubr.msk.f32.mxu0 %vm479_vm0, %v1812_v41  ;;  %2158 = vmatmul.mubr.msk.f32.gmra.mxu1 %vm479_vm0, %v1829_v38  ;;  %v1742_v25 = vsel %vm153_vm15, 1.0, %v2309_v48 }
  0xa9   :  { %v310_v40 = vpop.permute.xlu0 %309  ;;  %v361_v45 = vpop.permute.xlu1 %360  ;;  %2243 = vmatpush3.msra.mxu0 %v1122_v30 }
  0xaa   :  { %vm390_vm1 = vcmp.eq.s32.totalorder %v2580_v44, %v310_v40  ;;  %vm407_vm2 = vcmp.eq.s32.totalorder %v2580_v44, %v361_v45  ;;  %136 = vperm.xlu0 %2306, %v2482_v46   ;;  %139 = vperm.xlu1 %2307, %v2489_v49  }
  0xab   :  { %v1813_v50 = vsel %vm390_vm1, 1.0, %v2309_v48  ;;  %v1830_v51 = vsel %vm407_vm2, 1.0, %v2309_v48 }
  0xac   :  { %2134 = vmatmul.mubr.msk.f32.gmra.mxu0 %vm479_vm0, %v1813_v50  ;;  %2160 = vmatprep.mubr.msk.f32.mxu1 %vm479_vm0, %v1830_v51 }
  0xad   :  { %v364_v52 = vpop.permute.xlu0 %363  ;;  %v313_v53 = vpop.permute.xlu1 %312 }
  0xae   :  { %vm408_vm3 = vcmp.eq.s32.totalorder %v2580_v44, %v364_v52  ;;  %vm391_vm4 = vcmp.eq.s32.totalorder %v2580_v44, %v313_v53  ;;  %1239 = vperm.xlu0 %2306, %v1928_v7   ;;  %1242 = vperm.xlu1 %2307, %v1929_v10  }
  0xaf   :  { %v1831_v46 = vsel %vm408_vm3, 1.0, %v2309_v48  ;;  %v1814_v49 = vsel %vm391_vm4, 1.0, %v2309_v48  ;;  %vm154_vm3 = vcmp.eq.s32.totalorder %v2580_v44, %v2570_v36  ;;  %vm155_vm4 = vcmp.eq.s32.totalorder %v2580_v44, %v2564_v32 }
  0xb0   :  { %2136 = vmatprep.mubr.msk.f32.mxu0 %vm479_vm0, %v1814_v49  ;;  %2161 = vmatmul.mubr.msk.f32.gmra.mxu1 %vm479_vm0, %v1831_v46  ;;  %v1743_v26 = vsel %vm154_vm3, 1.0, %v2309_v48  ;;  %v1744_v27 = vsel %vm155_vm4, 1.0, %v2309_v48 }
  0xb1   :  { %v316_v55 = vpop.permute.xlu0 %315  ;;  %v367_v15 = vpop.permute.xlu1 %366 }
  0xb2   :  { %vm392_vm5 = vcmp.eq.s32.totalorder %v2580_v44, %v316_v55  ;;  %vm409_vm6 = vcmp.eq.s32.totalorder %v2580_v44, %v367_v15  ;;  %142 = vperm.xlu0 %2306, %v2504_v54   ;;  %145 = vperm.xlu1 %2307, %v2510_v57  }
  0xb3   :  { %v1815_v58 = vsel %vm392_vm5, 1.0, %v2309_v48  ;;  %v1832_v59 = vsel %vm409_vm6, 1.0, %v2309_v48 }
  0xb4   :  { %2137 = vmatmul.mubr.msk.f32.gmra.mxu0 %vm479_vm0, %v1815_v58  ;;  %2163 = vmatprep.mubr.msk.f32.mxu1 %vm479_vm0, %v1832_v59 }
  0xb5   :  { %v370_v60 = vpop.permute.xlu0 %369  ;;  %v319_v61 = vpop.permute.xlu1 %318 }
  0xb6   :  { %vm410_vm7 = vcmp.eq.s32.totalorder %v2580_v44, %v370_v60  ;;  %vm393_vm8 = vcmp.eq.s32.totalorder %v2580_v44, %v319_v61  ;;  %1245 = vperm.xlu0 %2306, %v1930_v20   ;;  %1248 = vperm.xlu1 %2307, %v1931_v56  }
  0xb7   :  { %v1833_v54 = vsel %vm410_vm7, 1.0, %v2309_v48  ;;  %v1816_v57 = vsel %vm393_vm8, 1.0, %v2309_v48  ;;  %vm156_vm7 = vcmp.eq.s32.totalorder %v2580_v44, %v2568_v35  ;;  %vm157_vm8 = vcmp.eq.s32.totalorder %v2580_v44, %v2578_v43 }
  0xb8   :  { %2139 = vmatprep.mubr.msk.f32.mxu0 %vm479_vm0, %v1816_v57  ;;  %2164 = vmatmul.mubr.msk.f32.gmra.mxu1 %vm479_vm0, %v1833_v54  ;;  %v1745_v3 = vsel %vm156_vm7, 1.0, %v2309_v48  ;;  %v1746_v43 = vsel %vm157_vm8, 1.0, %v2309_v48 }
  0xb9   :  { %v322_v63 = vpop.permute.xlu0 %321  ;;  %v373_v0 = vpop.permute.xlu1 %372 }
  0xba   :  { %vm394_vm9 = vcmp.eq.s32.totalorder %v2580_v44, %v322_v63  ;;  %vm411_vm10 = vcmp.eq.s32.totalorder %v2580_v44, %v373_v0  ;;  %148 = vperm.xlu0 %2306, %v2522_v62   ;;  %151 = vperm.xlu1 %2307, %v2534_v11  }
  0xbb   :  { %v1817_v28 = vsel %vm394_vm9, 1.0, %v2309_v48  ;;  %v1834_v12 = vsel %vm411_vm10, 1.0, %v2309_v48 }
  0xbc   :  { %2140 = vmatmul.mubr.msk.f32.gmra.mxu0 %vm479_vm0, %v1817_v28  ;;  %2166 = vmatprep.mubr.msk.f32.mxu1 %vm479_vm0, %v1834_v12 }
  0xbd   :  { %v376_v13 = vpop.permute.xlu0 %375  ;;  %v325_v14 = vpop.permute.xlu1 %324 }
  0xbe   :  { %vm412_vm11 = vcmp.eq.s32.totalorder %v2580_v44, %v376_v13  ;;  %vm395_vm12 = vcmp.eq.s32.totalorder %v2580_v44, %v325_v14  ;;  %1251 = vperm.xlu0 %2306, %v1932_v24   ;;  %1254 = vperm.xlu1 %2307, %v1933_v8  }
  0xbf   :  { %v1835_v62 = vsel %vm412_vm11, 1.0, %v2309_v48  ;;  %v1818_v11 = vsel %vm395_vm12, 1.0, %v2309_v48  ;;  %vm158_vm11 = vcmp.eq.s32.totalorder %v2580_v44, %v2576_v42  ;;  %vm159_vm12 = vcmp.eq.s32.totalorder %v2580_v44, %v2582_v47 }
  0xc0   :  { %2142 = vmatprep.mubr.msk.f32.mxu0 %vm479_vm0, %v1818_v11  ;;  %2167 = vmatmul.mubr.msk.f32.gmra.mxu1 %vm479_vm0, %v1835_v62  ;;  %v1747_v42 = vsel %vm158_vm11, 1.0, %v2309_v48  ;;  %v1748_v30 = vsel %vm159_vm12, 1.0, %v2309_v48 }
  0xc1   :  { %v328_v16 = vpop.permute.xlu0 %327  ;;  %v379_v17 = vpop.permute.xlu1 %378 }
  0xc2   :  { %vm396_vm13 = vcmp.eq.s32.totalorder %v2580_v44, %v328_v16  ;;  %vm413_vm14 = vcmp.eq.s32.totalorder %v2580_v44, %v379_v17 }
  0xc3   :  { %v1819_v18 = vsel %vm396_vm13, 1.0, %v2309_v48  ;;  %v1836_v19 = vsel %vm413_vm14, 1.0, %v2309_v48 }
  0xc4   :  { %2143 = vmatmul.mubr.msk.f32.gmra.mxu0 %vm479_vm0, %v1819_v18  ;;  %2169 = vmatprep.mubr.msk.f32.mxu1 %vm479_vm0, %v1836_v19 }
  0xc5   :  { %v382_v21 = vpop.permute.xlu0 %381  ;;  %v331_v22 = vpop.permute.xlu1 %330 }
  0xc6   :  { %vm414_vm1 = vcmp.eq.s32.totalorder %v2580_v44, %v382_v21  ;;  %vm397_vm2 = vcmp.eq.s32.totalorder %v2580_v44, %v331_v22 }
  0xc7   :  { %v1837_v23 = vsel %vm414_vm1, 1.0, %v2309_v48  ;;  %v1820_v31 = vsel %vm397_vm2, 1.0, %v2309_v48 }
  0xc8   :  { %2145 = vmatprep.mubr.msk.f32.mxu0 %vm479_vm0, %v1820_v31  ;;  %2170 = vmatmul.mubr.msk.f32.gmra.mxu1 %vm479_vm0, %v1837_v23 }
  0xc9   :  { %v334_v33 = vpop.permute.xlu0 %333  ;;  %2184 = vmatprep.mubr.msk.f32.mxu1 %vm479_vm0, %v1742_v25  ;;  %v1162_v34 = vpop.permute.xlu1 %1161 }
  0xca   :  { %vm398_vm5 = vcmp.eq.s32.totalorder %v2580_v44, %v334_v33  ;;  %vm1256_vm6 = vcmp.eq.s32.totalorder %v2580_v44, %v1162_v34 }
  0xcb   :  { %v1821_v2 = vsel %vm398_vm5, 1.0, %v2309_v48  ;;  %v1934_v36 = vsel %vm1256_vm6, 1.0, %v2309_v48 }
  0xcc   :  { %2146 = vmatmul.mubr.msk.f32.gmra.mxu0 %vm479_vm0, %v1821_v2  ;;  %2185 = vmatmul.mubr.msk.f32.vlgmr.msra.gmra.mxu1 %vm479_vm0, %v1743_v26 }
  0xcd   :  { %v1165_v32 = vpop.permute.xlu0 %1164  ;;  %2187 = vmatprep.mubr.msk.f32.mxu1 %vm479_vm0, %v1744_v27  ;;  %2244 = vmatprep.mubr.msk.f32.mxu0 %vm479_vm0, %v1934_v36  ;;  %v1168_v1 = vpop.permute.xlu1 %1167 }
  0xce   :  { %vm1257_vm9 = vcmp.eq.s32.totalorder %v2580_v44, %v1165_v32  ;;  %vm1258_vm10 = vcmp.eq.s32.totalorder %v2580_v44, %v1168_v1 }
  0xcf   :  { %v1935_v35 = vsel %vm1257_vm9, 1.0, %v2309_v48  ;;  %v1936_v4 = vsel %vm1258_vm10, 1.0, %v2309_v48 }
  0xd0   :  { %2188 = vmatmul.mubr.msk.f32.gmra.mxu1 %vm479_vm0, %v1745_v3  ;;  %2245 = vmatmul.mubr.msk.f32.vlgmr.msra.gmra.mxu0 %vm479_vm0, %v1935_v35 }
  0xd1   :  { %v1171_v5 = vpop.permute.xlu0 %1170  ;;  %2190 = vmatprep.mubr.msk.f32.mxu1 %vm479_vm0, %v1746_v43  ;;  %2247 = vmatprep.mubr.msk.f32.mxu0 %vm479_vm0, %v1936_v4  ;;  %v1174_v6 = vpop.permute.xlu1 %1173 }
  0xd2   :  { %vm1259_vm13 = vcmp.eq.s32.totalorder %v2580_v44, %v1171_v5  ;;  %vm1260_vm14 = vcmp.eq.s32.totalorder %v2580_v44, %v1174_v6 }
  0xd3   :  { %v1937_v9 = vsel %vm1259_vm13, 1.0, %v2309_v48  ;;  %v1938_v29 = vsel %vm1260_vm14, 1.0, %v2309_v48 }
  0xd4   :  { %2191 = vmatmul.mubr.msk.f32.gmra.mxu1 %vm479_vm0, %v1747_v42  ;;  %2248 = vmatmul.mubr.msk.f32.gmra.mxu0 %vm479_vm0, %v1937_v9 }
  0xd5   :  { %v1177_v47 = vpop.permute.xlu0 %1176  ;;  %2193 = vmatprep.mubr.msk.f32.mxu1 %vm479_vm0, %v1748_v30  ;;  %2250 = vmatprep.mubr.msk.f32.mxu0 %vm479_vm0, %v1938_v29  ;;  %v80_v37 = vpop.permute.xlu1 %79 }
  0xd6   :  { %vm1261_vm15 = vcmp.eq.s32.totalorder %v2580_v44, %v1177_v47  ;;  %vm160_vm1 = vcmp.eq.s32.totalorder %v2580_v44, %v80_v37 }
  0xd7   :  { %v1939_v39 = vsel %vm1261_vm15, 1.0, %v2309_v48  ;;  %v1749_v38 = vsel %vm160_vm1, 1.0, %v2309_v48 }
  0xd8   :  { %2194 = vmatmul.mubr.msk.f32.gmra.mxu1 %vm479_vm0, %v1749_v38  ;;  %2251 = vmatmul.mubr.msk.f32.gmra.mxu0 %vm479_vm0, %v1939_v39 }
  0xd9   :  { %v1180_v41 = vpop.permute.xlu0 %1179  ;;  %v1183_v40 = vpop.permute.xlu1 %1182 }
  0xda   :  { %vm1262_vm2 = vcmp.eq.s32.totalorder %v2580_v44, %v1180_v41  ;;  %vm1263_vm3 = vcmp.eq.s32.totalorder %v2580_v44, %v1183_v40 }
  0xdb   :  { %v1940_v45 = vsel %vm1262_vm2, 1.0, %v2309_v48  ;;  %v1941_v7 = vsel %vm1263_vm3, 1.0, %v2309_v48 }
  0xdc   :  { %2253 = vmatprep.mubr.msk.f32.mxu0 %vm479_vm0, %v1940_v45 }
  0xdd   :  { %v83_v10 = vpop.permute.xlu0 %82  ;;  %2254 = vmatmul.mubr.msk.f32.gmra.mxu0 %vm479_vm0, %v1941_v7  ;;  %v86_v50 = vpop.permute.xlu1 %85 }
  0xde   :  { %vm161_vm4 = vcmp.eq.s32.totalorder %v2580_v44, %v83_v10  ;;  %vm162_vm5 = vcmp.eq.s32.totalorder %v2580_v44, %v86_v50 }
  0xdf   :  { %v1750_v51 = vsel %vm161_vm4, 1.0, %v2309_v48  ;;  %v1751_v52 = vsel %vm162_vm5, 1.0, %v2309_v48 }
  0xe0   :  { %2196 = vmatprep.mubr.msk.f32.mxu1 %vm479_vm0, %v1750_v51 }
  0xe1   :  { %v1186_v53 = vpop.permute.xlu0 %1185  ;;  %2197 = vmatmul.mubr.msk.f32.gmra.mxu1 %vm479_vm0, %v1751_v52  ;;  %v1189_v46 = vpop.permute.xlu1 %1188 }
  0xe2   :  { %vm1264_vm6 = vcmp.eq.s32.totalorder %v2580_v44, %v1186_v53  ;;  %vm1265_vm7 = vcmp.eq.s32.totalorder %v2580_v44, %v1189_v46 }
  0xe3   :  { %v1942_v49 = vsel %vm1264_vm6, 1.0, %v2309_v48  ;;  %v1943_v55 = vsel %vm1265_vm7, 1.0, %v2309_v48 }
  0xe4   :  { %2256 = vmatprep.mubr.msk.f32.mxu0 %vm479_vm0, %v1942_v49 }
  0xe5   :  { %v89_v15 = vpop.permute.xlu0 %88  ;;  %2257 = vmatmul.mubr.msk.f32.gmra.mxu0 %vm479_vm0, %v1943_v55  ;;  %v92_v20 = vpop.permute.xlu1 %91 }
  0xe6   :  { %vm163_vm8 = vcmp.eq.s32.totalorder %v2580_v44, %v89_v15  ;;  %vm164_vm9 = vcmp.eq.s32.totalorder %v2580_v44, %v92_v20 }
  0xe7   :  { %v1752_v56 = vsel %vm163_vm8, 1.0, %v2309_v48  ;;  %v1753_v58 = vsel %vm164_vm9, 1.0, %v2309_v48 }
  0xe8   :  { %2199 = vmatprep.mubr.msk.f32.mxu1 %vm479_vm0, %v1752_v56 }
  0xe9   :  { %v1192_v59 = vpop.permute.xlu0 %1191  ;;  %2200 = vmatmul.mubr.msk.f32.gmra.mxu1 %vm479_vm0, %v1753_v58  ;;  %v1195_v60 = vpop.permute.xlu1 %1194 }
  0xea   :  { %vm1266_vm10 = vcmp.eq.s32.totalorder %v2580_v44, %v1192_v59  ;;  %vm1267_vm11 = vcmp.eq.s32.totalorder %v2580_v44, %v1195_v60 }
  0xeb   :  { %v1944_v61 = vsel %vm1266_vm10, 1.0, %v2309_v48  ;;  %v1945_v54 = vsel %vm1267_vm11, 1.0, %v2309_v48 }
  0xec   :  { %2259 = vmatprep.mubr.msk.f32.mxu0 %vm479_vm0, %v1944_v61 }
  0xed   :  { %v95_v57 = vpop.permute.xlu0 %94  ;;  %2260 = vmatmul.mubr.msk.f32.gmra.mxu0 %vm479_vm0, %v1945_v54  ;;  %v98_v63 = vpop.permute.xlu1 %97 }
  0xee   :  { %vm165_vm12 = vcmp.eq.s32.totalorder %v2580_v44, %v95_v57  ;;  %vm166_vm13 = vcmp.eq.s32.totalorder %v2580_v44, %v98_v63 }
  0xef   :  { %v1754_v0 = vsel %vm165_vm12, 1.0, %v2309_v48  ;;  %v1755_v24 = vsel %vm166_vm13, 1.0, %v2309_v48 }
  0xf0   :  { %2202 = vmatprep.mubr.msk.f32.mxu1 %vm479_vm0, %v1754_v0 }
  0xf1   :  { %v1198_v8 = vpop.permute.xlu0 %1197  ;;  %2203 = vmatmul.mubr.msk.f32.gmra.mxu1 %vm479_vm0, %v1755_v24  ;;  %v1201_v28 = vpop.permute.xlu1 %1200 }
  0xf2   :  { %vm1268_vm14 = vcmp.eq.s32.totalorder %v2580_v44, %v1198_v8  ;;  %vm1269_vm15 = vcmp.eq.s32.totalorder %v2580_v44, %v1201_v28 }
  0xf3   :  { %v1946_v12 = vsel %vm1268_vm14, 1.0, %v2309_v48  ;;  %v1947_v13 = vsel %vm1269_vm15, 1.0, %v2309_v48 }
  0xf4   :  { %2262 = vmatprep.mubr.msk.f32.mxu0 %vm479_vm0, %v1946_v12 }
  0xf5   :  { %v101_v14 = vpop.permute.xlu0 %100  ;;  %2263 = vmatmul.mubr.msk.f32.gmra.mxu0 %vm479_vm0, %v1947_v13  ;;  %v104_v62 = vpop.permute.xlu1 %103 }
  0xf6   :  { %vm167_vm1 = vcmp.eq.s32.totalorder %v2580_v44, %v101_v14  ;;  %vm168_vm2 = vcmp.eq.s32.totalorder %v2580_v44, %v104_v62 }
  0xf7   :  { %v1756_v11 = vsel %vm167_vm1, 1.0, %v2309_v48  ;;  %v1757_v16 = vsel %vm168_vm2, 1.0, %v2309_v48 }
  0xf8   :  { %2205 = vmatprep.mubr.msk.f32.mxu1 %vm479_vm0, %v1756_v11 }
  0xf9   :  { %v1204_v17 = vpop.permute.xlu0 %1203  ;;  %2206 = vmatmul.mubr.msk.f32.gmra.mxu1 %vm479_vm0, %v1757_v16  ;;  %v1207_v18 = vpop.permute.xlu1 %1206 }
  0xfa   :  { %vm1270_vm3 = vcmp.eq.s32.totalorder %v2580_v44, %v1204_v17  ;;  %vm1271_vm4 = vcmp.eq.s32.totalorder %v2580_v44, %v1207_v18 }
  0xfb   :  { %v1948_v19 = vsel %vm1270_vm3, 1.0, %v2309_v48  ;;  %v1949_v21 = vsel %vm1271_vm4, 1.0, %v2309_v48 }
  0xfc   :  { %2265 = vmatprep.mubr.msk.f32.mxu0 %vm479_vm0, %v1948_v19 }
  0xfd   :  { %v107_v22 = vpop.permute.xlu0 %106  ;;  %2266 = vmatmul.mubr.msk.f32.gmra.mxu0 %vm479_vm0, %v1949_v21  ;;  %v110_v23 = vpop.permute.xlu1 %109 }
  0xfe   :  { %vm169_vm5 = vcmp.eq.s32.totalorder %v2580_v44, %v107_v22  ;;  %vm170_vm6 = vcmp.eq.s32.totalorder %v2580_v44, %v110_v23 }
  0xff   :  { %v1758_v31 = vsel %vm169_vm5, 1.0, %v2309_v48  ;;  %v1759_v25 = vsel %vm170_vm6, 1.0, %v2309_v48 }
 0x100   :  { %2208 = vmatprep.mubr.msk.f32.mxu1 %vm479_vm0, %v1758_v31 }
 0x101   :  { %v1210_v33 = vpop.permute.xlu0 %1209  ;;  %2209 = vmatmul.mubr.msk.f32.gmra.mxu1 %vm479_vm0, %v1759_v25  ;;  %v1213_v34 = vpop.permute.xlu1 %1212 }
 0x102   :  { %vm1272_vm7 = vcmp.eq.s32.totalorder %v2580_v44, %v1210_v33  ;;  %vm1273_vm8 = vcmp.eq.s32.totalorder %v2580_v44, %v1213_v34 }
 0x103   :  { %v1950_v26 = vsel %vm1272_vm7, 1.0, %v2309_v48  ;;  %v1951_v2 = vsel %vm1273_vm8, 1.0, %v2309_v48 }
 0x104   :  { %2268 = vmatprep.mubr.msk.f32.mxu0 %vm479_vm0, %v1950_v26 }
 0x105   :  { %v113_v36 = vpop.permute.xlu0 %112  ;;  %2269 = vmatmul.mubr.msk.f32.gmra.mxu0 %vm479_vm0, %v1951_v2  ;;  %v116_v27 = vpop.permute.xlu1 %115 }
 0x106   :  { %vm171_vm9 = vcmp.eq.s32.totalorder %v2580_v44, %v113_v36  ;;  %vm172_vm10 = vcmp.eq.s32.totalorder %v2580_v44, %v116_v27 }
 0x107   :  { %v1760_v32 = vsel %vm171_vm9, 1.0, %v2309_v48  ;;  %v1761_v1 = vsel %vm172_vm10, 1.0, %v2309_v48 }
 0x108   :  { %2211 = vmatprep.mubr.msk.f32.mxu1 %vm479_vm0, %v1760_v32 }
 0x109   :  { %v1216_v3 = vpop.permute.xlu0 %1215  ;;  %2212 = vmatmul.mubr.msk.f32.gmra.mxu1 %vm479_vm0, %v1761_v1  ;;  %v1219_v35 = vpop.permute.xlu1 %1218 }
 0x10a   :  { %vm1274_vm11 = vcmp.eq.s32.totalorder %v2580_v44, %v1216_v3  ;;  %vm1275_vm12 = vcmp.eq.s32.totalorder %v2580_v44, %v1219_v35 }
 0x10b   :  { %v1952_v4 = vsel %vm1274_vm11, 1.0, %v2309_v48  ;;  %v1953_v43 = vsel %vm1275_vm12, 1.0, %v2309_v48 }
 0x10c   :  { %2271 = vmatprep.mubr.msk.f32.mxu0 %vm479_vm0, %v1952_v4 }
 0x10d   :  { %v119_v5 = vpop.permute.xlu0 %118  ;;  %2272 = vmatmul.mubr.msk.f32.gmra.mxu0 %vm479_vm0, %v1953_v43  ;;  %v122_v6 = vpop.permute.xlu1 %121 }
 0x10e   :  { %vm173_vm13 = vcmp.eq.s32.totalorder %v2580_v44, %v119_v5  ;;  %vm174_vm14 = vcmp.eq.s32.totalorder %v2580_v44, %v122_v6 }
 0x10f   :  { %v1762_v42 = vsel %vm173_vm13, 1.0, %v2309_v48  ;;  %v1763_v9 = vsel %vm174_vm14, 1.0, %v2309_v48 }
 0x110   :  { %2214 = vmatprep.mubr.msk.f32.mxu1 %vm479_vm0, %v1762_v42 }
 0x111   :  { %v1222_v29 = vpop.permute.xlu0 %1221  ;;  %2215 = vmatmul.mubr.msk.f32.gmra.mxu1 %vm479_vm0, %v1763_v9  ;;  %v1225_v30 = vpop.permute.xlu1 %1224 }
 0x112   :  { %vm1276_vm15 = vcmp.eq.s32.totalorder %v2580_v44, %v1222_v29  ;;  %vm1277_vm1 = vcmp.eq.s32.totalorder %v2580_v44, %v1225_v30 }
 0x113   :  { %v1954_v47 = vsel %vm1276_vm15, 1.0, %v2309_v48  ;;  %v1955_v37 = vsel %vm1277_vm1, 1.0, %v2309_v48 }
 0x114   :  { %2274 = vmatprep.mubr.msk.f32.mxu0 %vm479_vm0, %v1954_v47 }
 0x115   :  { %v125_v39 = vpop.permute.xlu0 %124  ;;  %2275 = vmatmul.mubr.msk.f32.gmra.mxu0 %vm479_vm0, %v1955_v37  ;;  %v128_v38 = vpop.permute.xlu1 %127 }
 0x116   :  { %vm175_vm2 = vcmp.eq.s32.totalorder %v2580_v44, %v125_v39  ;;  %vm176_vm3 = vcmp.eq.s32.totalorder %v2580_v44, %v128_v38 }
 0x117   :  { %v1764_v41 = vsel %vm175_vm2, 1.0, %v2309_v48  ;;  %v1765_v40 = vsel %vm176_vm3, 1.0, %v2309_v48 }
 0x118   :  { %2217 = vmatprep.mubr.msk.f32.mxu1 %vm479_vm0, %v1764_v41 }
 0x119   :  { %v1228_v45 = vpop.permute.xlu0 %1227  ;;  %2218 = vmatmul.mubr.msk.f32.gmra.mxu1 %vm479_vm0, %v1765_v40  ;;  %v1231_v7 = vpop.permute.xlu1 %1230 }
 0x11a   :  { %vm1278_vm4 = vcmp.eq.s32.totalorder %v2580_v44, %v1228_v45  ;;  %vm1279_vm5 = vcmp.eq.s32.totalorder %v2580_v44, %v1231_v7 }
 0x11b   :  { %v1956_v10 = vsel %vm1278_vm4, 1.0, %v2309_v48  ;;  %v1957_v50 = vsel %vm1279_vm5, 1.0, %v2309_v48 }
 0x11c   :  { %2277 = vmatprep.mubr.msk.f32.mxu0 %vm479_vm0, %v1956_v10 }
 0x11d   :  { %v131_v51 = vpop.permute.xlu0 %130  ;;  %2278 = vmatmul.mubr.msk.f32.gmra.mxu0 %vm479_vm0, %v1957_v50  ;;  %v134_v52 = vpop.permute.xlu1 %133 }
 0x11e   :  { %vm177_vm6 = vcmp.eq.s32.totalorder %v2580_v44, %v131_v51  ;;  %vm178_vm7 = vcmp.eq.s32.totalorder %v2580_v44, %v134_v52 }
 0x11f   :  { %v1766_v53 = vsel %vm177_vm6, 1.0, %v2309_v48  ;;  %v1767_v46 = vsel %vm178_vm7, 1.0, %v2309_v48 }
 0x120   :  { %2220 = vmatprep.mubr.msk.f32.mxu1 %vm479_vm0, %v1766_v53 }
 0x121   :  { %v1234_v49 = vpop.permute.xlu0 %1233  ;;  %2221 = vmatmul.mubr.msk.f32.gmra.mxu1 %vm479_vm0, %v1767_v46  ;;  %v1237_v55 = vpop.permute.xlu1 %1236 }
 0x122   :  { %vm1280_vm8 = vcmp.eq.s32.totalorder %v2580_v44, %v1234_v49  ;;  %vm1281_vm9 = vcmp.eq.s32.totalorder %v2580_v44, %v1237_v55 }
 0x123   :  { %v1958_v15 = vsel %vm1280_vm8, 1.0, %v2309_v48  ;;  %v1959_v20 = vsel %vm1281_vm9, 1.0, %v2309_v48 }
 0x124   :  { %2280 = vmatprep.mubr.msk.f32.mxu0 %vm479_vm0, %v1958_v15 }
 0x125   :  { %v137_v56 = vpop.permute.xlu0 %136  ;;  %2281 = vmatmul.mubr.msk.f32.gmra.mxu0 %vm479_vm0, %v1959_v20  ;;  %v140_v58 = vpop.permute.xlu1 %139 }
 0x126   :  { %vm179_vm10 = vcmp.eq.s32.totalorder %v2580_v44, %v137_v56  ;;  %vm180_vm11 = vcmp.eq.s32.totalorder %v2580_v44, %v140_v58 }
 0x127   :  { %v1768_v59 = vsel %vm179_vm10, 1.0, %v2309_v48  ;;  %v1769_v60 = vsel %vm180_vm11, 1.0, %v2309_v48 }
 0x128   :  { %2223 = vmatprep.mubr.msk.f32.mxu1 %vm479_vm0, %v1768_v59 }
 0x129   :  { %v1240_v61 = vpop.permute.xlu0 %1239  ;;  %2224 = vmatmul.mubr.msk.f32.gmra.mxu1 %vm479_vm0, %v1769_v60  ;;  %v1243_v54 = vpop.permute.xlu1 %1242 }
 0x12a   :  { %vm1282_vm12 = vcmp.eq.s32.totalorder %v2580_v44, %v1240_v61  ;;  %vm1283_vm13 = vcmp.eq.s32.totalorder %v2580_v44, %v1243_v54 }
 0x12b   :  { %v1960_v57 = vsel %vm1282_vm12, 1.0, %v2309_v48  ;;  %v1961_v63 = vsel %vm1283_vm13, 1.0, %v2309_v48 }
 0x12c   :  { %2283 = vmatprep.mubr.msk.f32.mxu0 %vm479_vm0, %v1960_v57 }
 0x12d   :  { %v143_v0 = vpop.permute.xlu0 %142  ;;  %2284 = vmatmul.mubr.msk.f32.gmra.mxu0 %vm479_vm0, %v1961_v63  ;;  %v146_v24 = vpop.permute.xlu1 %145 }
 0x12e   :  { %vm181_vm14 = vcmp.eq.s32.totalorder %v2580_v44, %v143_v0  ;;  %vm182_vm15 = vcmp.eq.s32.totalorder %v2580_v44, %v146_v24 }
 0x12f   :  { %v1770_v8 = vsel %vm181_vm14, 1.0, %v2309_v48  ;;  %v1771_v28 = vsel %vm182_vm15, 1.0, %v2309_v48 }
 0x130   :  { %2226 = vmatprep.mubr.msk.f32.mxu1 %vm479_vm0, %v1770_v8 }
 0x131   :  { %v1246_v12 = vpop.permute.xlu0 %1245  ;;  %2227 = vmatmul.mubr.msk.f32.gmra.mxu1 %vm479_vm0, %v1771_v28  ;;  %v1249_v13 = vpop.permute.xlu1 %1248 }
 0x132   :  { %vm1284_vm1 = vcmp.eq.s32.totalorder %v2580_v44, %v1246_v12  ;;  %vm1285_vm2 = vcmp.eq.s32.totalorder %v2580_v44, %v1249_v13 }
 0x133   :  { %v1962_v14 = vsel %vm1284_vm1, 1.0, %v2309_v48  ;;  %v1963_v62 = vsel %vm1285_vm2, 1.0, %v2309_v48 }
 0x134   :  { %2286 = vmatprep.mubr.msk.f32.mxu0 %vm479_vm0, %v1962_v14 }
 0x135   :  { %v149_v11 = vpop.permute.xlu0 %148  ;;  %2287 = vmatmul.mubr.msk.f32.gmra.mxu0 %vm479_vm0, %v1963_v62  ;;  %v152_v16 = vpop.permute.xlu1 %151 }
 0x136   :  { %vm183_vm3 = vcmp.eq.s32.totalorder %v2580_v44, %v149_v11  ;;  %vm184_vm4 = vcmp.eq.s32.totalorder %v2580_v44, %v152_v16 }
 0x137   :  { %v1772_v17 = vsel %vm183_vm3, 1.0, %v2309_v48  ;;  %v1773_v18 = vsel %vm184_vm4, 1.0, %v2309_v48 }
 0x138   :  { %2229 = vmatprep.mubr.msk.f32.mxu1 %vm479_vm0, %v1772_v17 }
 0x139   :  { %v1252_v19 = vpop.permute.xlu0 %1251  ;;  %2230 = vmatmul.mubr.msk.f32.gmra.mxu1 %vm479_vm0, %v1773_v18  ;;  %v1255_v21 = vpop.permute.xlu1 %1254 }
 0x13a   :  { %vm1286_vm5 = vcmp.eq.s32.totalorder %v2580_v44, %v1252_v19  ;;  %vm1287_vm6 = vcmp.eq.s32.totalorder %v2580_v44, %v1255_v21 }
 0x13b   :  { %v1964_v22 = vsel %vm1286_vm5, 1.0, %v2309_v48  ;;  %v1965_v23 = vsel %vm1287_vm6, 1.0, %v2309_v48 }
 0x13c   :  { %2289 = vmatprep.mubr.msk.f32.mxu0 %vm479_vm0, %v1964_v22 }
 0x13d   :  { %2290 = vmatmul.mubr.msk.f32.gmra.mxu0 %vm479_vm0, %v1965_v23  ;;  %vm1705_vm0 = vcmask 261120  }
 0x150   :  { %v2939_v31 = vpop.f32.mrf.mxu1 }
 0x152   :  { %v2941_v25 = vpop.f32.mrf.mxu1 }
 0x154   :  { %v2126_v33 = vpop.f32.mrf.mxu0 }
 0x156   :  { %v642_v26 = vpop.f32.mrf.mxu0 }
 0x158   :  { %v2943_v34 = vpop.f32.mrf.mxu1 }
 0x15a   :  { %v2945_v2 = vpop.f32.mrf.mxu1 }
 0x15c   :  { %v2129_v36 = vpop.f32.mrf.mxu0 }
 0x15e   :  { %v652_v27 = vpop.f32.mrf.mxu0 }
 0x160   :  { %v2947_v44 = vpop.f32.mrf.mxu1 }
 0x162   :  { %v2949_v32 = vpop.f32.mrf.mxu1 }
 0x164   :  { %v2132_v48 = vpop.f32.mrf.mxu0 }
 0x166   :  { %v662_v3 = vpop.f32.mrf.mxu0 }
 0x168   :  { %v2951_v1 = vpop.f32.mrf.mxu1 }
 0x16a   :  { %v2953_v35 = vpop.f32.mrf.mxu1 }
 0x16c   :  { %v2135_v4 = vpop.f32.mrf.mxu0 }
 0x16e   :  { %v672_v5 = vpop.f32.mrf.mxu0 }
 0x170   :  { %v2955_v43 = vpop.f32.mrf.mxu1 }
 0x172   :  { %v2957_v6 = vpop.f32.mrf.mxu1 }
 0x174   :  { %v2138_v42 = vpop.f32.mrf.mxu0 }
 0x176   :  { %v682_v29 = vpop.f32.mrf.mxu0 }
 0x178   :  { %v2959_v9 = vpop.f32.mrf.mxu1 }
 0x17a   :  { %v2961_v30 = vpop.f32.mrf.mxu1 }
 0x17c   :  { %v2963_v47 = vpop.f32.mrf.mxu0 }
 0x17e   :  { %v2967_v39 = vpop.f32.mrf.mxu0 }
 0x180   :  { %v2965_v37 = vpop.f32.mrf.mxu1 }
 0x182   :  { %v2969_v38 = vpop.f32.mrf.mxu1 }
 0x184   :  { %v2971_v41 = vpop.f32.mrf.mxu0 }
 0x186   :  { %v2975_v45 = vpop.f32.mrf.mxu0 }
 0x188   :  { %v2973_v40 = vpop.f32.mrf.mxu1 }
 0x18a   :  { %v2977_v7 = vpop.f32.mrf.mxu1 }
 0x18c   :  { %v2979_v10 = vpop.f32.mrf.mxu0  ;;  %v2186_v50 = vpop.f32.mrf.mxu1 }
 0x18d   :  { %v969_v53 = vadd.f32 %v2186_v50, %v2126_v33 }
 0x18e   :  { %v2981_v51 = vpop.f32.mrf.mxu0  ;;  %v963_v52 = vpop.f32.mrf.mxu1 }
 0x18f   :  { %v964_v55 = vadd.f32 %v963_v52, %v642_v26 }
 0x190   :  { %v2189_v46 = vpop.f32.mrf.mxu1  ;;  %v2246_v49 = vpop.f32.mrf.mxu0 }
 0x191   :  { %v1674_v15 = vadd.f32 %v2246_v49, %v969_v53  ;;  %v979_v58 = vadd.f32 %v2189_v46, %v2129_v36 }
 0x192   :  { %v973_v20 = vpop.f32.mrf.mxu1  ;;  %v1514_v56 = vpop.f32.mrf.mxu0 }
 0x193   :  { %1707 = vst.msk [vmem:[%s3137_s4 + $0x8] sm:$0xff] %vm1705_vm0, %v1674_v15  ;;  %v1673_v59 = vadd.f32 %v1514_v56, %v964_v55  ;;  %v974_v54 = vadd.f32 %v973_v20, %v652_v27 }
 0x194   :  { %v2192_v60 = vpop.f32.mrf.mxu1  ;;  %v2249_v61 = vpop.f32.mrf.mxu0 }
 0x195   :  { %1706 = vst.msk [vmem:[%s3137_s4] sm:$0xff] %vm1705_vm0, %v1673_v59  ;;  %v1676_v57 = vadd.f32 %v2249_v61, %v979_v58  ;;  %v989_v24 = vadd.f32 %v2192_v60, %v2132_v48 }
 0x196   :  { %v983_v63 = vpop.f32.mrf.mxu1  ;;  %v1524_v0 = vpop.f32.mrf.mxu0 }
 0x197   :  { %1709 = vst.msk [vmem:[%s3137_s4 + $0x18] sm:$0xff] %vm1705_vm0, %v1676_v57  ;;  %v1675_v8 = vadd.f32 %v1524_v0, %v974_v54  ;;  %v984_v13 = vadd.f32 %v983_v63, %v662_v3 }
 0x198   :  { %v2195_v28 = vpop.f32.mrf.mxu1  ;;  %v2252_v12 = vpop.f32.mrf.mxu0 }
 0x199   :  { %1708 = vst.msk [vmem:[%s3137_s4 + $0x10] sm:$0xff] %vm1705_vm0, %v1675_v8  ;;  %v1678_v14 = vadd.f32 %v2252_v12, %v989_v24  ;;  %v999_v17 = vadd.f32 %v2195_v28, %v2135_v4 }
 0x19a   :  { %v1534_v62 = vpop.f32.mrf.mxu0  ;;  %v993_v11 = vpop.f32.mrf.mxu1 }
 0x19b   :  { %1711 = vst.msk [vmem:[%s3137_s4 + $0x28] sm:$0xff] %vm1705_vm0, %v1678_v14  ;;  %v1677_v16 = vadd.f32 %v1534_v62, %v984_v13  ;;  %v994_v19 = vadd.f32 %v993_v11, %v672_v5 }
 0x19d   :  { %1710 = vst.msk [vmem:[%s3137_s4 + $0x20] sm:$0xff] %vm1705_vm0, %v1677_v16  ;;  %v2255_v18 = vpop.f32.mrf.mxu0 }
 0x19e   :  { %v1680_v21 = vadd.f32 %v2255_v18, %v999_v17 }
 0x19f   :  { %v1544_v22 = vpop.f32.mrf.mxu0 }
 0x1a0   :  { %1713 = vst.msk [vmem:[%s3137_s4 + $0x38] sm:$0xff] %vm1705_vm0, %v1680_v21  ;;  %v1679_v23 = vadd.f32 %v1544_v22, %v994_v19 }
 0x1a1   :  { %v2198_v33 = vpop.f32.mrf.mxu1 }
 0x1a2   :  { %1712 = vst.msk [vmem:[%s3137_s4 + $0x30] sm:$0xff] %vm1705_vm0, %v1679_v23  ;;  %v1009_v36 = vadd.f32 %v2198_v33, %v2138_v42 }
 0x1a3   :  { %v1003_v26 = vpop.f32.mrf.mxu1 }
 0x1a4   :  { %v1004_v48 = vadd.f32 %v1003_v26, %v682_v29 }
 0x1a5   :  { %v2258_v27 = vpop.f32.mrf.mxu0 }
 0x1a6   :  { %v1682_v3 = vadd.f32 %v2258_v27, %v1009_v36 }
 0x1a7   :  { %v1554_v4 = vpop.f32.mrf.mxu0 }
 0x1a8   :  { %1715 = vst.msk [vmem:[%s3137_s4 + $0x48] sm:$0xff] %vm1705_vm0, %v1682_v3  ;;  %v1681_v5 = vadd.f32 %v1554_v4, %v1004_v48 }
 0x1a9   :  { %v2201_v50 = vpop.f32.mrf.mxu1 }
 0x1aa   :  { %1714 = vst.msk [vmem:[%s3137_s4 + $0x40] sm:$0xff] %vm1705_vm0, %v1681_v5  ;;  %v1019_v53 = vadd.f32 %v2201_v50, %v2963_v47 }
 0x1ab   :  { %v1013_v52 = vpop.f32.mrf.mxu1 }
 0x1ac   :  { %v1014_v29 = vadd.f32 %v1013_v52, %v2967_v39 }
 0x1ad   :  { %v2261_v42 = vpop.f32.mrf.mxu0 }
 0x1ae   :  { %v1684_v46 = vadd.f32 %v2261_v42, %v1019_v53 }
 0x1af   :  { %v1564_v49 = vpop.f32.mrf.mxu0 }
 0x1b0   :  { %1717 = vst.msk [vmem:[%s3137_s4 + $0x58] sm:$0xff] %vm1705_vm0, %v1684_v46  ;;  %v1683_v55 = vadd.f32 %v1564_v49, %v1014_v29 }
 0x1b1   :  { %v2204_v15 = vpop.f32.mrf.mxu1 }
 0x1b2   :  { %1716 = vst.msk [vmem:[%s3137_s4 + $0x50] sm:$0xff] %vm1705_vm0, %v1683_v55  ;;  %v1029_v47 = vadd.f32 %v2204_v15, %v2971_v41 }
 0x1b3   :  { %v1023_v20 = vpop.f32.mrf.mxu1 }
 0x1b4   :  { %v1024_v39 = vadd.f32 %v1023_v20, %v2975_v45 }
 0x1b5   :  { %v2264_v56 = vpop.f32.mrf.mxu0 }
 0x1b6   :  { %v1686_v58 = vadd.f32 %v2264_v56, %v1029_v47 }
 0x1b7   :  { %v1574_v59 = vpop.f32.mrf.mxu0 }
 0x1b8   :  { %1719 = vst.msk [vmem:[%s3137_s4 + $0x68] sm:$0xff] %vm1705_vm0, %v1686_v58  ;;  %v1685_v60 = vadd.f32 %v1574_v59, %v1024_v39 }
 0x1b9   :  { %v2207_v61 = vpop.f32.mrf.mxu1 }
 0x1ba   :  { %1718 = vst.msk [vmem:[%s3137_s4 + $0x60] sm:$0xff] %vm1705_vm0, %v1685_v60  ;;  %v1039_v41 = vadd.f32 %v2207_v61, %v2979_v10 }
 0x1bb   :  { %v1033_v54 = vpop.f32.mrf.mxu1 }
 0x1bc   :  { %v1034_v45 = vadd.f32 %v1033_v54, %v2981_v51 }
 0x1bd   :  { %v2267_v57 = vpop.f32.mrf.mxu0 }
 0x1be   :  { %v1688_v63 = vadd.f32 %v2267_v57, %v1039_v41 }
 0x1bf   :  { %v1584_v0 = vpop.f32.mrf.mxu0 }
 0x1c0   :  { %1721 = vst.msk [vmem:[%s3137_s4 + $0x78] sm:$0xff] %vm1705_vm0, %v1688_v63  ;;  %v1687_v24 = vadd.f32 %v1584_v0, %v1034_v45 }
 0x1c1   :  { %v2210_v8 = vpop.f32.mrf.mxu1 }
 0x1c2   :  { %1720 = vst.msk [vmem:[%s3137_s4 + $0x70] sm:$0xff] %vm1705_vm0, %v1687_v24  ;;  %v1049_v10 = vadd.f32 %v2210_v8, %v2939_v31 }
 0x1c3   :  { %v1043_v28 = vpop.f32.mrf.mxu1 }
 0x1c4   :  { %v1044_v51 = vadd.f32 %v1043_v28, %v2941_v25 }
 0x1c5   :  { %v2270_v12 = vpop.f32.mrf.mxu0 }
 0x1c6   :  { %v1690_v13 = vadd.f32 %v2270_v12, %v1049_v10 }
 0x1c7   :  { %v1594_v14 = vpop.f32.mrf.mxu0 }
 0x1c8   :  { %1723 = vst.msk [vmem:[%s3137_s4 + $0x88] sm:$0xff] %vm1705_vm0, %v1690_v13  ;;  %v1689_v62 = vadd.f32 %v1594_v14, %v1044_v51 }
 0x1c9   :  { %v2213_v11 = vpop.f32.mrf.mxu1 }
 0x1ca   :  { %1722 = vst.msk [vmem:[%s3137_s4 + $0x80] sm:$0xff] %vm1705_vm0, %v1689_v62  ;;  %v1059_v31 = vadd.f32 %v2213_v11, %v2943_v34 }
 0x1cb   :  { %v1053_v16 = vpop.f32.mrf.mxu1 }
 0x1cc   :  { %v1054_v25 = vadd.f32 %v1053_v16, %v2945_v2 }
 0x1cd   :  { %v2273_v17 = vpop.f32.mrf.mxu0 }
 0x1ce   :  { %v1692_v18 = vadd.f32 %v2273_v17, %v1059_v31 }
 0x1cf   :  { %v1604_v19 = vpop.f32.mrf.mxu0 }
 0x1d0   :  { %1725 = vst.msk [vmem:[%s3137_s4 + $0x98] sm:$0xff] %vm1705_vm0, %v1692_v18  ;;  %v1691_v21 = vadd.f32 %v1604_v19, %v1054_v25 }
 0x1d1   :  { %v2216_v22 = vpop.f32.mrf.mxu1 }
 0x1d2   :  { %1724 = vst.msk [vmem:[%s3137_s4 + $0x90] sm:$0xff] %vm1705_vm0, %v1691_v21  ;;  %v1069_v34 = vadd.f32 %v2216_v22, %v2947_v44 }
 0x1d3   :  { %v1063_v23 = vpop.f32.mrf.mxu1 }
 0x1d4   :  { %v1064_v2 = vadd.f32 %v1063_v23, %v2949_v32 }
 0x1d5   :  { %v2276_v33 = vpop.f32.mrf.mxu0 }
 0x1d6   :  { %v1694_v26 = vadd.f32 %v2276_v33, %v1069_v34 }
 0x1d7   :  { %v1614_v36 = vpop.f32.mrf.mxu0 }
 0x1d8   :  { %1727 = vst.msk [vmem:[%s3137_s4 + $0xa8] sm:$0xff] %vm1705_vm0, %v1694_v26  ;;  %v1693_v27 = vadd.f32 %v1614_v36, %v1064_v2 }
 0x1d9   :  { %v2219_v48 = vpop.f32.mrf.mxu1 }
 0x1da   :  { %1726 = vst.msk [vmem:[%s3137_s4 + $0xa0] sm:$0xff] %vm1705_vm0, %v1693_v27  ;;  %v1079_v44 = vadd.f32 %v2219_v48, %v2951_v1 }
 0x1db   :  { %v1073_v3 = vpop.f32.mrf.mxu1 }
 0x1dc   :  { %v1074_v32 = vadd.f32 %v1073_v3, %v2953_v35 }
 0x1dd   :  { %v2279_v4 = vpop.f32.mrf.mxu0 }
 0x1de   :  { %v1696_v5 = vadd.f32 %v2279_v4, %v1079_v44 }
 0x1df   :  { %v1624_v50 = vpop.f32.mrf.mxu0 }
 0x1e0   :  { %1729 = vst.msk [vmem:[%s3137_s4 + $0xb8] sm:$0xff] %vm1705_vm0, %v1696_v5  ;;  %v1695_v52 = vadd.f32 %v1624_v50, %v1074_v32 }
 0x1e1   :  { %v2222_v53 = vpop.f32.mrf.mxu1 }
 0x1e2   :  { %1728 = vst.msk [vmem:[%s3137_s4 + $0xb0] sm:$0xff] %vm1705_vm0, %v1695_v52  ;;  %v1089_v1 = vadd.f32 %v2222_v53, %v2955_v43 }
 0x1e3   :  { %v1083_v42 = vpop.f32.mrf.mxu1 }
 0x1e4   :  { %v1084_v35 = vadd.f32 %v1083_v42, %v2957_v6 }
 0x1e5   :  { %v2282_v29 = vpop.f32.mrf.mxu0 }
 0x1e6   :  { %v1698_v46 = vadd.f32 %v2282_v29, %v1089_v1 }
 0x1e7   :  { %v1634_v49 = vpop.f32.mrf.mxu0 }
 0x1e8   :  { %1731 = vst.msk [vmem:[%s3137_s4 + $0xc8] sm:$0xff] %vm1705_vm0, %v1698_v46  ;;  %v1697_v55 = vadd.f32 %v1634_v49, %v1084_v35 }
 0x1e9   :  { %v2225_v15 = vpop.f32.mrf.mxu1 }
 0x1ea   :  { %1730 = vst.msk [vmem:[%s3137_s4 + $0xc0] sm:$0xff] %vm1705_vm0, %v1697_v55  ;;  %v1099_v43 = vadd.f32 %v2225_v15, %v2959_v9 }
 0x1eb   :  { %v1093_v20 = vpop.f32.mrf.mxu1 }
 0x1ec   :  { %v1094_v6 = vadd.f32 %v1093_v20, %v2961_v30 }
 0x1ed   :  { %v2285_v47 = vpop.f32.mrf.mxu0 }
 0x1ee   :  { %v1700_v56 = vadd.f32 %v2285_v47, %v1099_v43 }
 0x1ef   :  { %v1644_v39 = vpop.f32.mrf.mxu0 }
 0x1f0   :  { %1733 = vst.msk [vmem:[%s3137_s4 + $0xd8] sm:$0xff] %vm1705_vm0, %v1700_v56  ;;  %v1699_v58 = vadd.f32 %v1644_v39, %v1094_v6 }
 0x1f1   :  { %v2228_v59 = vpop.f32.mrf.mxu1 }
 0x1f2   :  { %1732 = vst.msk [vmem:[%s3137_s4 + $0xd0] sm:$0xff] %vm1705_vm0, %v1699_v58  ;;  %v1109_v9 = vadd.f32 %v2228_v59, %v2965_v37 }
 0x1f3   :  { %v1103_v60 = vpop.f32.mrf.mxu1 }
 0x1f4   :  { %v1104_v30 = vadd.f32 %v1103_v60, %v2969_v38 }
 0x1f5   :  { %v2288_v61 = vpop.f32.mrf.mxu0 }
 0x1f6   :  { %v1702_v54 = vadd.f32 %v2288_v61, %v1109_v9 }
 0x1f7   :  { %v1654_v41 = vpop.f32.mrf.mxu0 }
 0x1f8   :  { %1735 = vst.msk [vmem:[%s3137_s4 + $0xe8] sm:$0xff] %vm1705_vm0, %v1702_v54  ;;  %v1701_v57 = vadd.f32 %v1654_v41, %v1104_v30 }
 0x1f9   :  { %v2231_v45 = vpop.f32.mrf.mxu1 }
 0x1fa   :  { %1734 = vst.msk [vmem:[%s3137_s4 + $0xe0] sm:$0xff] %vm1705_vm0, %v1701_v57  ;;  %v1119_v37 = vadd.f32 %v2231_v45, %v2973_v40 }
 0x1fb   :  { %v1113_v63 = vpop.f32.mrf.mxu1 }
 0x1fc   :  { %v1114_v38 = vadd.f32 %v1113_v63, %v2977_v7 }
 0x1fd   :  { %v2291_v0 = vpop.f32.mrf.mxu0 }
 0x1fe   :  { %v1704_v24 = vadd.f32 %v2291_v0, %v1119_v37 }
 0x1ff   :  { %v1664_v8 = vpop.f32.mrf.mxu0 }
 0x200   :  { %1737 = vst.msk [vmem:[%s3137_s4 + $0xf8] sm:$0xff] %vm1705_vm0, %v1704_v24  ;;  %v1703_v28 = vadd.f32 %v1664_v8, %v1114_v38 }
 0x202   :  { %1736 = vst.msk [vmem:[%s3137_s4 + $0xf0] sm:$0xff] %vm1705_vm0, %v1703_v28 }

</bundles_post_ra>
